<compile_context>
chip_gen: v7x
topology: tpu7x:2x2x1
jax: 0.10.0
libtpu: 0.0.40
codegen_flags: <defaults>
</compile_context>

<pallas_src>
import functools

import jax
import jax.numpy as jnp
from jax.experimental import pallas as pl
from jax.experimental.pallas import tpu as pltpu


def basic_block_kernel(x_ref, w_ref, b_ref, o_ref):
    """One batch tile of: out = relu(x @ W + b).

    x_ref: (TB, Kp)  bf16   (batch tile, padded in-features)
    w_ref: (Kp, Np)  bf16   (padded weights, resident across the whole grid)
    b_ref: (1,  Np)  f32
    o_ref: (TB, Np)  f32
    """
    acc = jnp.dot(x_ref[...], w_ref[...], preferred_element_type=jnp.float32)
    acc = acc + b_ref[...]                       # broadcast over batch rows
    o_ref[...] = jnp.maximum(acc, 0.0).astype(o_ref.dtype)


def _round_up(x, m):
    return ((x + m - 1) // m) * m


@functools.partial(jax.jit, static_argnames=("block_b",))
def basic_block_forward(x, w, b, *, block_b=128):
    """BasicBlock forward: relu(x @ W + b).

    x : (..., input_d)           float32
    w : (input_d, output_d)      float32  (PyTorch weight pre-transposed)
    b : (output_d,)              float32
    """
    assert block_b % 16 == 0, "batch tile must be a multiple of 16 (bf16 sublane)"
    d_in, d_out = w.shape
    lead = x.shape[:-1]
    x2d = x.reshape(-1, d_in)
    B = x2d.shape[0]

    # Lane-dense feature dims (multiple of 128); batch padded to the tile size.
    d_in_p = _round_up(d_in, 128)
    d_out_p = _round_up(d_out, 128)
    b8 = _round_up(max(B, 1), 8)
    tb = block_b if b8 > block_b else b8      # either multiple of 16, or == full B_p
    b_p = _round_up(max(B, 1), tb)

    x_pad = jnp.pad(x2d.astype(jnp.float32), ((0, b_p - B), (0, d_in_p - d_in)))
    w_pad = jnp.pad(w.astype(jnp.float32), ((0, d_in_p - d_in), (0, d_out_p - d_out)))
    bias_pad = jnp.pad(b.reshape(1, -1).astype(jnp.float32),
                       ((0, 0), (0, d_out_p - d_out)))

    # Feed the MXU bf16 operands; accumulation stays f32 inside the kernel.
    x_bf = x_pad.astype(jnp.bfloat16)
    w_bf = w_pad.astype(jnp.bfloat16)

    grid = (b_p // tb,)
    out = pl.pallas_call(
        basic_block_kernel,
        out_shape=jax.ShapeDtypeStruct((b_p, d_out_p), jnp.float32),
        grid_spec=pltpu.PrefetchScalarGridSpec(
            num_scalar_prefetch=0,
            grid=grid,
            in_specs=[
                pl.BlockSpec((tb, d_in_p), lambda i: (i, 0)),        # x: row tiles
                pl.BlockSpec((d_in_p, d_out_p), lambda i: (0, 0)),   # W: resident
                pl.BlockSpec((1, d_out_p), lambda i: (0, 0)),        # b: resident
            ],
            out_specs=pl.BlockSpec((tb, d_out_p), lambda i: (i, 0)),
        ),
        compiler_params=pltpu.CompilerParams(
            dimension_semantics=("parallel",),        # shard batch tiles on v7x TCs
            vmem_limit_bytes=48 * 1024 * 1024,        # portable to v7x's 64 MiB VMEM
        ),
    )(x_bf, w_bf, bias_pad)

    out = out[:B, :d_out]
    return out.reshape(*lead, d_out)


def basic_block_reference(x, w, b):
    """Pure-JAX f32 reference matching the PyTorch module."""
    return jnp.maximum(x @ w + b, 0.0)


if __name__ == "__main__":
    # Small shapes consistent with the module: batch=32, input_d=64, output_d=32.
    B, input_d, output_d = 32, 64, 32

    key = jax.random.PRNGKey(0)
    kx, kw, kb = jax.random.split(key, 3)
    x = jax.random.normal(kx, (B, input_d), dtype=jnp.float32)
    bound = 1.0 / (input_d ** 0.5)                       # PyTorch Linear default init range
    w = jax.random.uniform(kw, (input_d, output_d), jnp.float32, -bound, bound)
    b = jax.random.uniform(kb, (output_d,), jnp.float32, -bound, bound)

    # block_b=16 -> grid=(2,) so the batch-tiled path (index_map, resident weights)
    # is exercised even at this small batch.
    out = basic_block_forward(x, w, b, block_b=16)
    out = jax.block_until_ready(out)

    ref = basic_block_reference(x, w, b)
    assert out.shape == (B, output_d), out.shape
    # bf16 MXU operands with f32 accumulation: expect ~1e-2-level agreement vs f32.
    assert jnp.allclose(out, ref, atol=2e-2, rtol=2e-2), \
        float(jnp.max(jnp.abs(out - ref)))

    print("KERNEL_OK")
</pallas_src>

<mosaic_0001>
module attributes {stable_mosaic.version = 11 : i64} {
  func.func @basic_block_kernel(%arg0: i32, %arg1: memref<16x128xbf16, #tpu.memory_space<vmem>>, %arg2: memref<128x128xbf16, #tpu.memory_space<vmem>>, %arg3: memref<1x128xf32, #tpu.memory_space<vmem>>, %arg4: memref<16x128xf32, #tpu.memory_space<vmem>>) attributes {dimension_semantics = [#tpu.dimension_semantics<parallel>], iteration_bounds = array<i64: 2>, scalar_prefetch = 0 : i64, scratch_operands = 0 : i64, tpu.core_type = #tpu.core_type<tc>, window_params = [{transform_indices = @transform_0, window_bounds = array<i64: 16, 128>}, {pipeline_mode = #tpu.pipeline_mode<synchronous>, transform_indices = @transform_1, window_bounds = array<i64: 128, 128>}, {pipeline_mode = #tpu.pipeline_mode<synchronous>, transform_indices = @transform_2, window_bounds = array<i64: 1, 128>}, {transform_indices = @transform_3, window_bounds = array<i64: 16, 128>}]} {
    %c0 = arith.constant 0 : index
    %c0_0 = arith.constant 0 : index
    %0 = vector.load %arg1[%c0, %c0_0] : memref<16x128xbf16, #tpu.memory_space<vmem>>, vector<16x128xbf16>
    %c0_1 = arith.constant 0 : index
    %c0_2 = arith.constant 0 : index
    %1 = vector.load %arg2[%c0_1, %c0_2] : memref<128x128xbf16, #tpu.memory_space<vmem>>, vector<128x128xbf16>
    %cst = arith.constant dense<0.000000e+00> : vector<16x128xf32>
    %2 = tpu.matmul %0, %1, %cst {dimension_numbers = #tpu.dot_dimension_numbers<[1], [0], [0], [1], [0, 0, 1, 1], [], []>} : vector<16x128xbf16>, vector<128x128xbf16>, vector<16x128xf32> -> vector<16x128xf32>
    %c0_3 = arith.constant 0 : index
    %c0_4 = arith.constant 0 : index
    %3 = vector.load %arg3[%c0_3, %c0_4] : memref<1x128xf32, #tpu.memory_space<vmem>>, vector<1x128xf32>
    %4 = vector.broadcast %3 : vector<1x128xf32> to vector<16x128xf32>
    %5 = arith.addf %2, %4 : vector<16x128xf32>
    %cst_5 = arith.constant 0.000000e+00 : f32
    %6 = vector.broadcast %cst_5 : f32 to vector<16x128xf32>
    %7 = arith.maximumf %5, %6 : vector<16x128xf32>
    %c0_6 = arith.constant 0 : index
    %c0_7 = arith.constant 0 : index
    %8 = vector.load %arg4[%c0_6, %c0_7] : memref<16x128xf32, #tpu.memory_space<vmem>>, vector<16x128xf32>
    tpu.vector_store %arg4[%c0_6, %c0_7], %7 {strides = array<i32>} : memref<16x128xf32, #tpu.memory_space<vmem>>, vector<16x128xf32>,
    return
  }
  func.func @transform_0(%arg0: i32) -> (i32, i32) {
    %c0_i32 = arith.constant 0 : i32
    %c0_i32_0 = arith.constant 0 : i32
    return %arg0, %c0_i32 : i32, i32
  }
  func.func @transform_1(%arg0: i32) -> (i32, i32) {
    %c0_i32 = arith.constant 0 : i32
    %c0_i32_0 = arith.constant 0 : i32
    %c0_i32_1 = arith.constant 0 : i32
    return %c0_i32, %c0_i32_0 : i32, i32
  }
  func.func @transform_2(%arg0: i32) -> (i32, i32) {
    %c0_i32 = arith.constant 0 : i32
    %c0_i32_0 = arith.constant 0 : i32
    %c0_i32_1 = arith.constant 0 : i32
    return %c0_i32, %c0_i32_0 : i32, i32
  }
  func.func @transform_3(%arg0: i32) -> (i32, i32) {
    %c0_i32 = arith.constant 0 : i32
    %c0_i32_0 = arith.constant 0 : i32
    return %arg0, %c0_i32 : i32, i32
  }
}

</mosaic_0001>

<bundles_post_ra>
// kernel: basic_block_forward.1
= control target key start
LH: loop header
LB: loop body
LE: loop exit
PB: predicated region body
PF: predicated region fallthrough
CT: control target
= control target key end

     0   :  { %8 = vsyncpa [#allocation3], 0  ;;  %s695_s0 = inlined_call_operand.vmem [shape: bf16[32,128], index: 0, kind: input, shape index: {}]   ;;  %s696_s1 = inlined_call_operand.vmem [shape: bf16[128,128], index: 1, kind: input, shape index: {}]   ;;  %s697_s2 = inlined_call_operand.vmem [shape: f32[1,128], index: 2, kind: input, shape index: {}]   ;;  %s698_s3 = inlined_call_operand.hbm [shape: f32[32,128], index: 3, kind: output, shape index: {}]  }
   0x1   :  { %10 = vsyncpa [#allocation3 + $0x1], 0  ;;  %s566_s12 = smov 0   ;;  %s568_s13 = smov 0  }
   0x2   :  { %s570_s14 = smov 0   ;;  %s572_s15 = smov 0  }
   0x3 LB: > { %s587_s16 = sadd.s32 4294967295, %s539_s15   ;;  %s373_s17 = sadd.s32 4294967294, %s539_s15   ;;  %s539_s15 = sphi %s572_s15, %s704_s15   ;;  %s535_s14 = sphi %s570_s14, %s703_s14   ;;  %s531_s13 = sphi %s568_s13, %s702_s13   ;;  %s527_s12 = sphi %s566_s12, %s701_s12  }
   0x4   : > { %s591_s18 = sadd.s32 1, %s539_s15   ;;  %s91_s19 = sadd.s32 1, %s535_s14 }
   0x5   : > { %s88_s20 = ssub.s32 %s539_s15, %s591_s18  ;;  %p101_p0 = scmp.ne.s32.totalorder %s535_s14, %s531_s13 }
   0x6   : > { %p89_p1 = scmp.eq.s32.totalorder %s88_s20, 0  ;;  %p102_p2 = scmp.eq.s32.totalorder %s587_s16, 1 }
   0x7   : > { %p107_p3 = scmp.ne.s32.totalorder %s531_s13, %s527_s12  ;;  %p108_p4 = scmp.eq.s32.totalorder %s373_s17, 1 }
   0x8   : > { %s602_s21 = scalar_select %p89_p1, %s535_s14, %s91_s19  }
   0x9   : > { %p604_p5 = por %p102_p2, %p101_p0  ;;  %p608_p6 = por %p108_p4, %p107_p3 }
   0xa   : > { %p376_p7 = scmp.ge.s32.totalorder %s539_s15, 1  ;;  %p141_p8 = scmp.lt.s32.totalorder %s539_s15, 3 }
   0xc   : > { %p142_p9 = pnand %p376_p7, %p141_p8 }
   0xd   : > { %v468_v0 = vld [vmem:[%s696_s1] sm:$0xff] (!%p142_p9)   ;;  %v541_v1 = vmov (!%p142_p9), 0.0   ;;  %v469_v2 = vld [vmem:[%s696_s1 + $0x8] sm:$0xff] (!%p142_p9)   ;;  %vm542_vm0 = vmmov (!%p142_p9), 0   ;;  %s378_s28 = sshll.u32 (!%p142_p9), %s587_s16, 1  ;;  %v470_v3 = vld [vmem:[%s696_s1 + $0x10] sm:$0xff] (!%p142_p9)  }
   0xe   : > { %145 = sbr.rel (%p142_p9) target bundleno = 279 (0x117), region = 32  ;;  %405 = vmatprep.subr.bf16.mxu0 (!%p142_p9), %v541_v1  ;;  %421 = vmatprep.mubr.msk.bf16.mxu0 (!%p142_p9), %vm542_vm0, %v541_v1  ;;  %p166_p10 = scmp.lt.s32.totalorder (!%p142_p9), %s378_s28, 3  ;;  %v471_v4 = vld [vmem:[%s696_s1 + $0x18] sm:$0xff] (!%p142_p9)   ;;  %v472_v5 = vld [vmem:[%s696_s1 + $0x20] sm:$0xff] (!%p142_p9)   ;;  %v473_v6 = vld [vmem:[%s696_s1 + $0x28] sm:$0xff] (!%p142_p9)  }
   0xf   : > { %406 = vmatpush3.bf16.msra.mxu0 (!%p142_p9), %v468_v0  ;;  %v474_v7 = vld [vmem:[%s696_s1 + $0x30] sm:$0xff] (!%p142_p9)   ;;  %v475_v8 = vld [vmem:[%s696_s1 + $0x38] sm:$0xff] (!%p142_p9)   ;;  %s162_s27 = sand.u32 (!%p142_p9), 1, %s531_s13   ;;  %v380_v10 = vld [vmem:[%s697_s2] ss:$0 sm:$0xff] (!%p142_p9)  ;;  %s395_s6 = sshll.u32 (!%p142_p9), %s587_s16, 8 }
  0x10   : > { %407 = vmatprep.subr.bf16.mxu0 (!%p142_p9), %v541_v1  ;;  %s652_s9 = scalar_lea.hbm (!%p142_p9), %s698_s3, %s395_s6  ;;  %s654_s10 = scalar_lea.sflag (!%p142_p9), [#allocation3], %s162_s27 }
  0x11   : > { %s543_s11 = smov (!%p142_p9), [#allocation2]  }
  0x12   : > { %s481_s17 = sshll.u32 (!%p142_p9), %s543_s11, 4  ;;  %s482_s17 = int_to_ptr.vmem [resolvable:$false] %s481_s17 }
  0x13   : > { %408 = vmatpush3.bf16.msra.mxu0 (!%p142_p9), %v469_v2  ;;  %s483_s19 = scalar_lea.vmem (!%p142_p9), %s482_s17, 512 }
  0x14   : > { %409 = vmatprep.subr.bf16.mxu0 (!%p142_p9), %v541_v1 }
  0x15   : > { %s706_s28 = smov (!%p166_p10, %s378_s28), 3 }
  0x16   : > { %s379_s4 = sshll.u32 %s706_s28, 2  ;;  %s377_s28 = sshll.u32 %s162_s27, 4 }
  0x17   : > { %s169_s7 = scalar_lea.vmem %s695_s0, %s379_s4  ;;  %410 = vmatpush3.bf16.msra.mxu0 %v470_v3  ;;  %s164_s4 = scalar_lea.vmem [#allocation2], %s377_s28 }
  0x18   : > { %411 = vmatprep.subr.bf16.mxu0 %v541_v1  ;;  %v476_v9 = vld [vmem:[%s169_s7] sm:$0xff]   ;;  %s311_s5 = sshll.u32 %s164_s4, 4  ;;  %s647_s5 = int_to_ptr.vmem [resolvable:$true] %s311_s5 }
  0x19   : > { %s477_s16 = scalar_lea.vmem %s647_s5, 256  ;;  %p484_p0 = scmp.lt.s32.totalorder %s647_s5, %s482_s17 }
  0x1a   : > { %p478_p11 = scmp.ne.s32.totalorder %s647_s5, %s477_s16  ;;  %p485_p1 = scmp.lt.s32.totalorder %s483_s19, %s477_s16 }
  0x1b   : > { %412 = vmatpush3.bf16.msra.mxu0 %v471_v4 }
  0x1c   : > { %413 = vmatprep.subr.bf16.mxu0 %v541_v1  ;;  %p479_p12 = pnand %p478_p11, %p604_p5  ;;  %p486_p2 = por %p485_p1, %p484_p0 }
  0x1e   : > { %p480_p13 = pneg %p479_p12 }
  0x1f   : > { %414 = vmatpush3.bf16.msra.mxu0 %v472_v5 }
  0x20   : > { %415 = vmatprep.subr.bf16.mxu0 %v541_v1  ;;  %p487_p3 = pnand %p486_p2, %p480_p13 }
  0x23   : > { %416 = vmatpush3.bf16.msra.mxu0 %v473_v6 }
  0x24   : > { %417 = vmatprep.subr.bf16.mxu0 %v541_v1 }
  0x27   : > { %418 = vmatpush3.bf16.msra.mxu0 %v474_v7 }
  0x28   : > { %419 = vmatprep.subr.bf16.mxu0 %v541_v1 }
  0x2b   : > { %420 = vmatpush3.bf16.msra.mxu0 %v475_v8 }
  0x2e   : > { %422 = vmatmul.mubr.bf16.vlgmr.msra.gmra.mrb[0].mxu0 %v476_v9 }
 0x101   : > { %v286_v11 = vpop.f32.mrb[0].mxu0 }
 0x102   : > { %v287_v12 = vadd.f32 %v380_v10, %v286_v11  ;;  %v423_v13 = vpop.f32.mrb[1].mxu0 }
 0x103   : > { %v289_v14 = vpop.f32.mrb[2].mxu0 }
 0x104   : > { %v293_v15 = vmax.f32 %v287_v12, 0.0  ;;  %v290_v16 = vadd.f32 %v380_v10, %v289_v14  ;;  %v424_v17 = vpop.f32.mrb[3].mxu0 }
 0x106   : > { %295 = vst [vmem:[%s164_s4] sm:$0xff] %v293_v15  ;;  %v294_v18 = vmax.f32 %v290_v16, 0.0 }
 0x108   : > { %296 = vst [vmem:[%s164_s4 + $0x8] sm:$0xff] %v294_v18 }
 0x109   : > { %490 = shalt.err (!%p487_p3)
}
 0x10a   : > { %s491_s20 = scalar_lea.hbm %s652_s9, 256  ;;  %s495_s26 = scalar_lea.hbm %s698_s3, 512 }
 0x10b   : > { %p492_p4 = scmp.ne.s32.totalorder %s652_s9, %s491_s20  ;;  %p496_p9 = scmp.lt.u32.totalorder %s652_s9, %s698_s3 }
 0x10c   : > { %p497_p10 = scmp.lt.u32.totalorder %s495_s26, %s491_s20  ;;  %p499_p12 = scmp.lt.u32.totalorder %s491_s20, %s652_s9 }
 0x10d   : > { %p493_p7 = pnand %p492_p4, %p604_p5 }
 0x10e   : > { %p498_p11 = por %p497_p10, %p496_p9 }
 0x10f   : > { %p494_p8 = pneg %p493_p7 }
 0x110   : > { %p500_p13 = por %p499_p12, %p498_p11 }
 0x112   : > { %p501_p0 = pnand %p500_p13, %p494_p8 }
 0x114   : > { %504 = shalt.err (!%p501_p0)
}
 0x115   : > { %s544_s29 = smov 128   ;;  %s545_s30 = smov 8  }
 0x116   : > { %425 = dma.vmem_to_hbm [thread:$0]  (%p604_p5), %s647_s5, 256, %s652_s9, %s654_s10, %s544_s29, %s544_s29, %s545_s30  }
 0x117 PF: > { %p431_p1 = scmp.ge.s32.totalorder %s539_s15, 2  ;;  %s326_s4 = sand.u32 1, %s527_s12  }
 0x118   : > { %s327_s6 = scalar_lea.sflag [#allocation3], %s326_s4 }
 0x119   : > { %p428_p2 = pnand %p431_p1, %p608_p6 }
 0x11b   : > { %522 = dma.done.wait (!%p428_p2), %s327_s6, 256  }
 0x11c   : > { %524 = vsyncadd (!%p428_p2), %s327_s6, 4294967040  ;;  %p13_p3 = scmp.ge.s32.totalorder %s591_s18, 4   ;;  %s701_s12 = smov %s531_s13 }
 0x11d   : > { %s702_s13 = smov %s535_s14  ;;  %s703_s14 = smov %s602_s21 }
 0x11e   : > { %s704_s15 = smov %s591_s18  ;;  %15 = sbr.rel (!%p13_p3) target bundleno = 3 (0x3), region = 67 }
 0x125   :  { %332 = vsyncpa [#allocation3], 1 }
 0x126   :  { %334 = vsyncpa [#allocation3 + $0x1], 1 }

</bundles_post_ra>
